<compile_context>
chip_gen: v5e
topology: v5e:2x2
jax: 0.10.0
libtpu: 0.0.40
codegen_flags: <defaults>
</compile_context>

<pallas_src>
import functools
import math

import jax
import jax.numpy as jnp
import numpy as np
from jax.experimental import pallas as pl
from jax.experimental.pallas import tpu as pltpu

T_DIM = 16
HALF = T_DIM // 2


def _round_up(n, m):
    return ((n + m - 1) // m) * m


def _cdiv(a, b):
    return -(-a // b)


def _pad_to(a, shape):
    pads = [(0, s - d) for d, s in zip(a.shape, shape)]
    return jnp.pad(a, pads)


def _is_megacore_tpu():
    """True on chips with 2 TensorCores per chip (v7x, v4, v5p)."""
    try:
        kind = (getattr(jax.devices()[0], "device_kind", "") or "").lower()
        return ("v7" in kind) or ("v4" in kind) or ("v5p" in kind)
    except Exception:
        return False


def _mish(x):
    # mish(x) = x * tanh(softplus(x)).
    # tanh(log1p(e^x)) = (u^2 + 2u) / (u^2 + 2u + 2), u = e^x  -> one exp (EUP).
    # Clamp the exp argument: for x > 30 the ratio is 1.0 to f32 precision.
    u = jnp.exp(jnp.minimum(x, 30.0))
    n = u * (u + 2.0)
    d = n + 2.0
    # approx reciprocal on the EUP slot + one Newton step (VALU) -> ~2^-24 rel err.
    r = pl.reciprocal(d, approx=True)
    r = r * (2.0 - d * r)
    return x * (n * r)


def mlp_kernel(xs_ref, freq_ref,
               wt1s_ref, wt1c_ref, bt1_ref,
               w1xs_ref, w1t_ref, b1_ref,
               w2_ref, b2_ref, w3_ref, b3_ref,
               wf_ref, bf_ref, out_ref, *, t_col):
    # `time` rides in the spare (zero-weight) column of the xs block.
    t = xs_ref[:, t_col:t_col + 1]                   # (TB, 1)

    # ---- SinusoidalPosEmb(t_dim=16); freq is a host-precomputed (1, 8) table ----
    ang = t * freq_ref[...]                          # (TB, 8)
    sin_e = jnp.sin(ang)
    cos_e = jnp.cos(ang)

    # ---- time_mlp first Linear(16,32) on cat([sin,cos]) -> Mish ----
    th = _mish(jnp.dot(sin_e, wt1s_ref[...], preferred_element_type=jnp.float32)
               + jnp.dot(cos_e, wt1c_ref[...], preferred_element_type=jnp.float32)
               + bt1_ref[...])                       # (TB, 32)

    # ---- trunk layer 1: xs @ w1xs + th @ (wt2 @ w1t) + (b1 + bt2 @ w1t) ----
    # (wt2 / bt2 were folded into w1t / b1 on the host; exact algebra.)
    h = _mish(jnp.dot(xs_ref[...], w1xs_ref[...], preferred_element_type=jnp.float32)
              + jnp.dot(th, w1t_ref[...], preferred_element_type=jnp.float32)
              + b1_ref[...])                         # (TB, 128) lane-dense
    h = _mish(jnp.dot(h, w2_ref[...], preferred_element_type=jnp.float32) + b2_ref[...])
    h = _mish(jnp.dot(h, w3_ref[...], preferred_element_type=jnp.float32) + b3_ref[...])

    # ---- final layer: lane-dense (TB, 128) store; wrapper slices [:, :A] ----
    out_ref[...] = (jnp.dot(h, wf_ref[...], preferred_element_type=jnp.float32)
                    + bf_ref[...])


def init_params(key, state_dim, action_dim, hidden_dim, t_dim=T_DIM):
    """Xavier-uniform weights (matching nn.init.xavier_uniform_), zero biases.
    Weights stored as (in_features, out_features)."""
    def xavier(k, fan_in, fan_out):
        bound = math.sqrt(6.0 / (fan_in + fan_out))
        return jax.random.uniform(k, (fan_in, fan_out), jnp.float32, -bound, bound)

    ks = jax.random.split(key, 6)
    input_dim = state_dim + action_dim + t_dim
    return dict(
        wt1=xavier(ks[0], t_dim, 2 * t_dim),
        bt1=jnp.zeros((1, 2 * t_dim), jnp.float32),
        wt2=xavier(ks[1], 2 * t_dim, t_dim),
        bt2=jnp.zeros((1, t_dim), jnp.float32),
        w1=xavier(ks[2], input_dim, hidden_dim),
        b1=jnp.zeros((1, hidden_dim), jnp.float32),
        w2=xavier(ks[3], hidden_dim, hidden_dim),
        b2=jnp.zeros((1, hidden_dim), jnp.float32),
        w3=xavier(ks[4], hidden_dim, hidden_dim),
        b3=jnp.zeros((1, hidden_dim), jnp.float32),
        wf=xavier(ks[5], hidden_dim, action_dim),
        bf=jnp.zeros((1, action_dim), jnp.float32),
    )


def pack_params(params, state_dim, action_dim, t_dim=T_DIM):
    """One-time host-side packing:
       * split cat-matmul weights,
       * fold wt2/bt2 of the time-MLP into w1t/b1 (exact algebra),
       * zero-pad hidden / output feature dims to 128 lanes,
       * reserve one spare zero-weight column in w1xs for the `time` scalar,
       * precompute the sinusoidal frequency table."""
    A, S = action_dim, state_dim
    H = params["w2"].shape[0]
    HP = _round_up(H, 128)                 # padded hidden width (lane-dense)
    AP = _round_up(A, 128)                 # padded output width (lane-dense store)
    XSP = _round_up(A + S + 1, 8)          # +1 spare column carries `time`
    half = t_dim // 2

    freq = jnp.exp(-(math.log(10000.0) / (half - 1))
                   * jnp.arange(half, dtype=jnp.float32)).reshape(1, half)

    wt1 = params["wt1"]
    w1 = params["w1"]
    w1t_orig = w1[A + S:]                                  # (t_dim, H)
    w1t_comp = params["wt2"] @ w1t_orig                    # (2*t_dim, H)
    b1_comp = params["b1"] + params["bt2"] @ w1t_orig      # (1, H)

    packed = dict(
        freq=freq,
        wt1s=wt1[:half], wt1c=wt1[half:], bt1=params["bt1"],
        # rows >= A+S are zero, so the `time` column contributes nothing here
        w1xs=_pad_to(w1[:A + S], (XSP, HP)),
        w1t=_pad_to(w1t_comp, (2 * t_dim, HP)),
        b1=_pad_to(b1_comp, (1, HP)),
        w2=_pad_to(params["w2"], (HP, HP)), b2=_pad_to(params["b2"], (1, HP)),
        w3=_pad_to(params["w3"], (HP, HP)), b3=_pad_to(params["b3"], (1, HP)),
        wf=_pad_to(params["wf"], (HP, AP)), bf=_pad_to(params["bf"], (1, AP)),
    )
    meta = dict(A=A, S=S, XSP=XSP, AP=AP, T_COL=A + S)
    return packed, meta


_WEIGHT_NAMES = ("freq", "wt1s", "wt1c", "bt1",
                 "w1xs", "w1t", "b1", "w2", "b2", "w3", "b3", "wf", "bf")


def mlp_forward(x, time, state, packed, meta, *, tb=1024, force_two_steps=None):
    """Forward pass matching PyTorch MLP.forward(x, time, state)."""
    B = x.shape[0]
    A, XSP, AP, t_col = meta["A"], meta["XSP"], meta["AP"], meta["T_COL"]

    # Host-side concat of [x, state, time]; `time` sits in the spare column whose
    # w1xs row is zero (it only feeds the sinusoidal path inside the kernel).
    xs = jnp.concatenate(
        [x.astype(jnp.float32),
         state.astype(jnp.float32),
         time.astype(jnp.float32).reshape(B, 1)], axis=1)
    xs = _pad_to(xs, (B, XSP))

    # ---- grid / tile selection ----
    # g grid steps, TB rows per step, TB multiple of 8, Bp = g*TB hugs B.
    if force_two_steps is None:
        force_two_steps = _is_megacore_tpu()
    g = max(1, _cdiv(B, tb))
    if force_two_steps and g == 1 and B >= 16:
        g = 2                         # keep both TensorCores busy on 2-TC chips
    TB = _round_up(_cdiv(B, g), 8)
    Bp = g * TB
    if Bp != B:
        xs = jnp.pad(xs, ((0, Bp - B), (0, 0)))

    weights = tuple(packed[n] for n in _WEIGHT_NAMES)

    # Weights: full-array blocks, constant index map -> DMA'd once, VMEM-resident.
    w_specs = [pl.BlockSpec(w.shape, lambda i: (0, 0)) for w in weights]

    out = pl.pallas_call(
        functools.partial(mlp_kernel, t_col=t_col),
        out_shape=jax.ShapeDtypeStruct((Bp, AP), jnp.float32),
        grid=(g,),
        in_specs=[pl.BlockSpec((TB, XSP), lambda i: (i, 0))] + w_specs,
        out_specs=pl.BlockSpec((TB, AP), lambda i: (i, 0)),
        compiler_params=pltpu.CompilerParams(
            dimension_semantics=("parallel",)),
    )(xs, *weights)

    # Note: at very large B a consumer accepting the padded (Bp, AP) layout could
    # skip this slice and its extra HBM round-trip; kept here for exact semantics.
    return out[:B, :A]


def mlp_reference(x, time, state, params, t_dim=T_DIM):
    """Pure-JAX reference mirroring the PyTorch forward, for validation."""
    half = t_dim // 2
    freq = jnp.exp(-(math.log(10000.0) / (half - 1))
                   * jnp.arange(half, dtype=jnp.float32))
    ang = time.astype(jnp.float32)[:, None] * freq[None, :]
    emb = jnp.concatenate([jnp.sin(ang), jnp.cos(ang)], axis=1)

    def mish(v):
        return v * jnp.tanh(jax.nn.softplus(v))

    th = mish(emb @ params["wt1"] + params["bt1"])
    t_mlp = th @ params["wt2"] + params["bt2"]
    h = jnp.concatenate([x, state, t_mlp], axis=1)
    h = mish(h @ params["w1"] + params["b1"])
    h = mish(h @ params["w2"] + params["b2"])
    h = mish(h @ params["w3"] + params["b3"])
    return h @ params["wf"] + params["bf"]


if __name__ == "__main__":
    STATE_DIM, ACTION_DIM, HIDDEN_DIM = 17, 6, 32

    key = jax.random.PRNGKey(0)
    k_p, k_x, k_s, k_t = jax.random.split(key, 4)

    params = init_params(k_p, STATE_DIM, ACTION_DIM, HIDDEN_DIM)
    packed, meta = pack_params(params, STATE_DIM, ACTION_DIM)

    # Small-shape case (matches the module's typical use: B=2) -> single grid step.
    B = 2
    x = jax.random.normal(k_x, (B, ACTION_DIM), jnp.float32)
    state = jax.random.normal(k_s, (B, STATE_DIM), jnp.float32)
    time = jax.random.uniform(k_t, (B,), jnp.float32, 0.0, 100.0)

    out = jax.block_until_ready(mlp_forward(x, time, state, packed, meta))
    ref = mlp_reference(x, time, state, params)
    np.testing.assert_allclose(np.asarray(out), np.asarray(ref),
                               atol=2e-4, rtol=2e-4)

    # Larger, non-divisible batch: exercises the adaptive tile (Bp=304, not 512).
    B2 = 300
    k_x2, k_s2, k_t2 = jax.random.split(jax.random.PRNGKey(1), 3)
    x2 = jax.random.normal(k_x2, (B2, ACTION_DIM), jnp.float32)
    state2 = jax.random.normal(k_s2, (B2, STATE_DIM), jnp.float32)
    time2 = jax.random.uniform(k_t2, (B2,), jnp.float32, 0.0, 100.0)

    out2 = jax.block_until_ready(mlp_forward(x2, time2, state2, packed, meta))
    ref2 = mlp_reference(x2, time2, state2, params)
    np.testing.assert_allclose(np.asarray(out2), np.asarray(ref2),
                               atol=2e-4, rtol=2e-4)

    # Explicit 2-step grid (megacore path) on the same batch, regardless of chip.
    out3 = jax.block_until_ready(
        mlp_forward(x2, time2, state2, packed, meta, force_two_steps=True))
    np.testing.assert_allclose(np.asarray(out3), np.asarray(ref2),
                               atol=2e-4, rtol=2e-4)

    print("KERNEL_OK")
</pallas_src>

<mosaic_0001>
module attributes {stable_mosaic.version = 11 : i64} {
  func.func @mlp_kernel(%arg0: i32, %arg1: memref<8x24xf32, #tpu.memory_space<vmem>>, %arg2: memref<1x8xf32, #tpu.memory_space<vmem>>, %arg3: memref<8x32xf32, #tpu.memory_space<vmem>>, %arg4: memref<8x32xf32, #tpu.memory_space<vmem>>, %arg5: memref<1x32xf32, #tpu.memory_space<vmem>>, %arg6: memref<24x128xf32, #tpu.memory_space<vmem>>, %arg7: memref<32x128xf32, #tpu.memory_space<vmem>>, %arg8: memref<1x128xf32, #tpu.memory_space<vmem>>, %arg9: memref<128x128xf32, #tpu.memory_space<vmem>>, %arg10: memref<1x128xf32, #tpu.memory_space<vmem>>, %arg11: memref<128x128xf32, #tpu.memory_space<vmem>>, %arg12: memref<1x128xf32, #tpu.memory_space<vmem>>, %arg13: memref<128x128xf32, #tpu.memory_space<vmem>>, %arg14: memref<1x128xf32, #tpu.memory_space<vmem>>, %arg15: memref<8x128xf32, #tpu.memory_space<vmem>>) attributes {dimension_semantics = [#tpu.dimension_semantics<parallel>], iteration_bounds = array<i64: 1>, scalar_prefetch = 0 : i64, scratch_operands = 0 : i64, tpu.core_type = #tpu.core_type<tc>, window_params = [{transform_indices = @transform_0, window_bounds = array<i64: 8, 24>}, {pipeline_mode = #tpu.pipeline_mode<synchronous>, transform_indices = @transform_1, window_bounds = array<i64: 1, 8>}, {pipeline_mode = #tpu.pipeline_mode<synchronous>, transform_indices = @transform_2, window_bounds = array<i64: 8, 32>}, {pipeline_mode = #tpu.pipeline_mode<synchronous>, transform_indices = @transform_3, window_bounds = array<i64: 8, 32>}, {pipeline_mode = #tpu.pipeline_mode<synchronous>, transform_indices = @transform_4, window_bounds = array<i64: 1, 32>}, {pipeline_mode = #tpu.pipeline_mode<synchronous>, transform_indices = @transform_5, window_bounds = array<i64: 24, 128>}, {pipeline_mode = #tpu.pipeline_mode<synchronous>, transform_indices = @transform_6, window_bounds = array<i64: 32, 128>}, {pipeline_mode = #tpu.pipeline_mode<synchronous>, transform_indices = @transform_7, window_bounds = array<i64: 1, 128>}, {pipeline_mode = #tpu.pipeline_mode<synchronous>, transform_indices = @transform_8, window_bounds = array<i64: 128, 128>}, {pipeline_mode = #tpu.pipeline_mode<synchronous>, transform_indices = @transform_9, window_bounds = array<i64: 1, 128>}, {pipeline_mode = #tpu.pipeline_mode<synchronous>, transform_indices = @transform_10, window_bounds = array<i64: 128, 128>}, {pipeline_mode = #tpu.pipeline_mode<synchronous>, transform_indices = @transform_11, window_bounds = array<i64: 1, 128>}, {pipeline_mode = #tpu.pipeline_mode<synchronous>, transform_indices = @transform_12, window_bounds = array<i64: 128, 128>}, {pipeline_mode = #tpu.pipeline_mode<synchronous>, transform_indices = @transform_13, window_bounds = array<i64: 1, 128>}, {transform_indices = @transform_14, window_bounds = array<i64: 8, 128>}]} {
    %c0 = arith.constant 0 : index
    %c23 = arith.constant 23 : index
    %0 = vector.load %arg1[%c0, %c23] : memref<8x24xf32, #tpu.memory_space<vmem>>, vector<8x1xf32>
    %c0_0 = arith.constant 0 : index
    %c0_1 = arith.constant 0 : index
    %1 = vector.load %arg2[%c0_0, %c0_1] : memref<1x8xf32, #tpu.memory_space<vmem>>, vector<1x8xf32>
    %2 = vector.broadcast %0 : vector<8x1xf32> to vector<8x8xf32>
    %3 = vector.broadcast %1 : vector<1x8xf32> to vector<8x8xf32>
    %4 = arith.mulf %2, %3 : vector<8x8xf32>
    %5 = math.sin %4 : vector<8x8xf32>
    %6 = math.cos %4 : vector<8x8xf32>
    %c0_2 = arith.constant 0 : index
    %c0_3 = arith.constant 0 : index
    %7 = vector.load %arg3[%c0_2, %c0_3] : memref<8x32xf32, #tpu.memory_space<vmem>>, vector<8x32xf32>
    %cst = arith.constant dense<0.000000e+00> : vector<8x32xf32>
    %8 = tpu.matmul %5, %7, %cst {dimension_numbers = #tpu.dot_dimension_numbers<[1], [0], [0], [1], [0, 0, 1, 1], [], []>} : vector<8x8xf32>, vector<8x32xf32>, vector<8x32xf32> -> vector<8x32xf32>
    %c0_4 = arith.constant 0 : index
    %c0_5 = arith.constant 0 : index
    %9 = vector.load %arg4[%c0_4, %c0_5] : memref<8x32xf32, #tpu.memory_space<vmem>>, vector<8x32xf32>
    %cst_6 = arith.constant dense<0.000000e+00> : vector<8x32xf32>
    %10 = tpu.matmul %6, %9, %cst_6 {dimension_numbers = #tpu.dot_dimension_numbers<[1], [0], [0], [1], [0, 0, 1, 1], [], []>} : vector<8x8xf32>, vector<8x32xf32>, vector<8x32xf32> -> vector<8x32xf32>
    %11 = arith.addf %8, %10 : vector<8x32xf32>
    %c0_7 = arith.constant 0 : index
    %c0_8 = arith.constant 0 : index
    %12 = vector.load %arg5[%c0_7, %c0_8] : memref<1x32xf32, #tpu.memory_space<vmem>>, vector<1x32xf32>
    %13 = vector.broadcast %12 : vector<1x32xf32> to vector<8x32xf32>
    %14 = arith.addf %11, %13 : vector<8x32xf32>
    %cst_9 = arith.constant 3.000000e+01 : f32
    %15 = vector.broadcast %cst_9 : f32 to vector<8x32xf32>
    %16 = arith.minimumf %14, %15 : vector<8x32xf32>
    %17 = math.exp %16 : vector<8x32xf32>
    %cst_10 = arith.constant 2.000000e+00 : f32
    %18 = vector.broadcast %cst_10 : f32 to vector<8x32xf32>
    %19 = arith.addf %17, %18 : vector<8x32xf32>
    %20 = arith.mulf %17, %19 : vector<8x32xf32>
    %cst_11 = arith.constant 2.000000e+00 : f32
    %21 = vector.broadcast %cst_11 : f32 to vector<8x32xf32>
    %22 = arith.addf %20, %21 : vector<8x32xf32>
    %23 = tpu.reciprocal %22 {approx = true} : vector<8x32xf32> -> vector<8x32xf32>
    %24 = arith.mulf %22, %23 : vector<8x32xf32>
    %cst_12 = arith.constant 2.000000e+00 : f32
    %25 = vector.broadcast %cst_12 : f32 to vector<8x32xf32>
    %26 = arith.subf %25, %24 : vector<8x32xf32>
    %27 = arith.mulf %23, %26 : vector<8x32xf32>
    %28 = arith.mulf %20, %27 : vector<8x32xf32>
    %29 = arith.mulf %14, %28 : vector<8x32xf32>
    %c0_13 = arith.constant 0 : index
    %c0_14 = arith.constant 0 : index
    %30 = vector.load %arg1[%c0_13, %c0_14] : memref<8x24xf32, #tpu.memory_space<vmem>>, vector<8x24xf32>
    %c0_15 = arith.constant 0 : index
    %c0_16 = arith.constant 0 : index
    %31 = vector.load %arg6[%c0_15, %c0_16] : memref<24x128xf32, #tpu.memory_space<vmem>>, vector<24x128xf32>
    %cst_17 = arith.constant dense<0.000000e+00> : vector<8x128xf32>
    %32 = tpu.matmul %30, %31, %cst_17 {dimension_numbers = #tpu.dot_dimension_numbers<[1], [0], [0], [1], [0, 0, 1, 1], [], []>} : vector<8x24xf32>, vector<24x128xf32>, vector<8x128xf32> -> vector<8x128xf32>
    %c0_18 = arith.constant 0 : index
    %c0_19 = arith.constant 0 : index
    %33 = vector.load %arg7[%c0_18, %c0_19] : memref<32x128xf32, #tpu.memory_space<vmem>>, vector<32x128xf32>
    %cst_20 = arith.constant dense<0.000000e+00> : vector<8x128xf32>
    %34 = tpu.matmul %29, %33, %cst_20 {dimension_numbers = #tpu.dot_dimension_numbers<[1], [0], [0], [1], [0, 0, 1, 1], [], []>} : vector<8x32xf32>, vector<32x128xf32>, vector<8x128xf32> -> vector<8x128xf32>
    %35 = arith.addf %32, %34 : vector<8x128xf32>
    %c0_21 = arith.constant 0 : index
    %c0_22 = arith.constant 0 : index
    %36 = vector.load %arg8[%c0_21, %c0_22] : memref<1x128xf32, #tpu.memory_space<vmem>>, vector<1x128xf32>
    %37 = vector.broadcast %36 : vector<1x128xf32> to vector<8x128xf32>
    %38 = arith.addf %35, %37 : vector<8x128xf32>
    %cst_23 = arith.constant 3.000000e+01 : f32
    %39 = vector.broadcast %cst_23 : f32 to vector<8x128xf32>
    %40 = arith.minimumf %38, %39 : vector<8x128xf32>
    %41 = math.exp %40 : vector<8x128xf32>
    %cst_24 = arith.constant 2.000000e+00 : f32
    %42 = vector.broadcast %cst_24 : f32 to vector<8x128xf32>
    %43 = arith.addf %41, %42 : vector<8x128xf32>
    %44 = arith.mulf %41, %43 : vector<8x128xf32>
    %cst_25 = arith.constant 2.000000e+00 : f32
    %45 = vector.broadcast %cst_25 : f32 to vector<8x128xf32>
    %46 = arith.addf %44, %45 : vector<8x128xf32>
    %47 = tpu.reciprocal %46 {approx = true} : vector<8x128xf32> -> vector<8x128xf32>
    %48 = arith.mulf %46, %47 : vector<8x128xf32>
    %cst_26 = arith.constant 2.000000e+00 : f32
    %49 = vector.broadcast %cst_26 : f32 to vector<8x128xf32>
    %50 = arith.subf %49, %48 : vector<8x128xf32>
    %51 = arith.mulf %47, %50 : vector<8x128xf32>
    %52 = arith.mulf %44, %51 : vector<8x128xf32>
    %53 = arith.mulf %38, %52 : vector<8x128xf32>
    %c0_27 = arith.constant 0 : index
    %c0_28 = arith.constant 0 : index
    %54 = vector.load %arg9[%c0_27, %c0_28] : memref<128x128xf32, #tpu.memory_space<vmem>>, vector<128x128xf32>
    %cst_29 = arith.constant dense<0.000000e+00> : vector<8x128xf32>
    %55 = tpu.matmul %53, %54, %cst_29 {dimension_numbers = #tpu.dot_dimension_numbers<[1], [0], [0], [1], [0, 0, 1, 1], [], []>} : vector<8x128xf32>, vector<128x128xf32>, vector<8x128xf32> -> vector<8x128xf32>
    %c0_30 = arith.constant 0 : index
    %c0_31 = arith.constant 0 : index
    %56 = vector.load %arg10[%c0_30, %c0_31] : memref<1x128xf32, #tpu.memory_space<vmem>>, vector<1x128xf32>
    %57 = vector.broadcast %56 : vector<1x128xf32> to vector<8x128xf32>
    %58 = arith.addf %55, %57 : vector<8x128xf32>
    %cst_32 = arith.constant 3.000000e+01 : f32
    %59 = vector.broadcast %cst_32 : f32 to vector<8x128xf32>
    %60 = arith.minimumf %58, %59 : vector<8x128xf32>
    %61 = math.exp %60 : vector<8x128xf32>
    %cst_33 = arith.constant 2.000000e+00 : f32
    %62 = vector.broadcast %cst_33 : f32 to vector<8x128xf32>
    %63 = arith.addf %61, %62 : vector<8x128xf32>
    %64 = arith.mulf %61, %63 : vector<8x128xf32>
    %cst_34 = arith.constant 2.000000e+00 : f32
    %65 = vector.broadcast %cst_34 : f32 to vector<8x128xf32>
    %66 = arith.addf %64, %65 : vector<8x128xf32>
    %67 = tpu.reciprocal %66 {approx = true} : vector<8x128xf32> -> vector<8x128xf32>
    %68 = arith.mulf %66, %67 : vector<8x128xf32>
    %cst_35 = arith.constant 2.000000e+00 : f32
    %69 = vector.broadcast %cst_35 : f32 to vector<8x128xf32>
    %70 = arith.subf %69, %68 : vector<8x128xf32>
    %71 = arith.mulf %67, %70 : vector<8x128xf32>
    %72 = arith.mulf %64, %71 : vector<8x128xf32>
    %73 = arith.mulf %58, %72 : vector<8x128xf32>
    %c0_36 = arith.constant 0 : index
    %c0_37 = arith.constant 0 : index
    %74 = vector.load %arg11[%c0_36, %c0_37] : memref<128x128xf32, #tpu.memory_space<vmem>>, vector<128x128xf32>
    %cst_38 = arith.constant dense<0.000000e+00> : vector<8x128xf32>
    %75 = tpu.matmul %73, %74, %cst_38 {dimension_numbers = #tpu.dot_dimension_numbers<[1], [0], [0], [1], [0, 0, 1, 1], [], []>} : vector<8x128xf32>, vector<128x128xf32>, vector<8x128xf32> -> vector<8x128xf32>
    %c0_39 = arith.constant 0 : index
    %c0_40 = arith.constant 0 : index
    %76 = vector.load %arg12[%c0_39, %c0_40] : memref<1x128xf32, #tpu.memory_space<vmem>>, vector<1x128xf32>
    %77 = vector.broadcast %76 : vector<1x128xf32> to vector<8x128xf32>
    %78 = arith.addf %75, %77 : vector<8x128xf32>
    %cst_41 = arith.constant 3.000000e+01 : f32
    %79 = vector.broadcast %cst_41 : f32 to vector<8x128xf32>
    %80 = arith.minimumf %78, %79 : vector<8x128xf32>
    %81 = math.exp %80 : vector<8x128xf32>
    %cst_42 = arith.constant 2.000000e+00 : f32
    %82 = vector.broadcast %cst_42 : f32 to vector<8x128xf32>
    %83 = arith.addf %81, %82 : vector<8x128xf32>
    %84 = arith.mulf %81, %83 : vector<8x128xf32>
    %cst_43 = arith.constant 2.000000e+00 : f32
    %85 = vector.broadcast %cst_43 : f32 to vector<8x128xf32>
    %86 = arith.addf %84, %85 : vector<8x128xf32>
    %87 = tpu.reciprocal %86 {approx = true} : vector<8x128xf32> -> vector<8x128xf32>
    %88 = arith.mulf %86, %87 : vector<8x128xf32>
    %cst_44 = arith.constant 2.000000e+00 : f32
    %89 = vector.broadcast %cst_44 : f32 to vector<8x128xf32>
    %90 = arith.subf %89, %88 : vector<8x128xf32>
    %91 = arith.mulf %87, %90 : vector<8x128xf32>
    %92 = arith.mulf %84, %91 : vector<8x128xf32>
    %93 = arith.mulf %78, %92 : vector<8x128xf32>
    %c0_45 = arith.constant 0 : index
    %c0_46 = arith.constant 0 : index
    %94 = vector.load %arg13[%c0_45, %c0_46] : memref<128x128xf32, #tpu.memory_space<vmem>>, vector<128x128xf32>
    %cst_47 = arith.constant dense<0.000000e+00> : vector<8x128xf32>
    %95 = tpu.matmul %93, %94, %cst_47 {dimension_numbers = #tpu.dot_dimension_numbers<[1], [0], [0], [1], [0, 0, 1, 1], [], []>} : vector<8x128xf32>, vector<128x128xf32>, vector<8x128xf32> -> vector<8x128xf32>
    %c0_48 = arith.constant 0 : index
    %c0_49 = arith.constant 0 : index
    %96 = vector.load %arg14[%c0_48, %c0_49] : memref<1x128xf32, #tpu.memory_space<vmem>>, vector<1x128xf32>
    %97 = vector.broadcast %96 : vector<1x128xf32> to vector<8x128xf32>
    %98 = arith.addf %95, %97 : vector<8x128xf32>
    %c0_50 = arith.constant 0 : index
    %c0_51 = arith.constant 0 : index
    %99 = vector.load %arg15[%c0_50, %c0_51] : memref<8x128xf32, #tpu.memory_space<vmem>>, vector<8x128xf32>
    tpu.vector_store %arg15[%c0_50, %c0_51], %98 {strides = array<i32>} : memref<8x128xf32, #tpu.memory_space<vmem>>, vector<8x128xf32>,
    return
  }
  func.func @transform_0(%arg0: i32) -> (i32, i32) {
    %c0_i32 = arith.constant 0 : i32
    %c0_i32_0 = arith.constant 0 : i32
    return %arg0, %c0_i32 : i32, i32
  }
  func.func @transform_1(%arg0: i32) -> (i32, i32) {
    %c0_i32 = arith.constant 0 : i32
    %c0_i32_0 = arith.constant 0 : i32
    %c0_i32_1 = arith.constant 0 : i32
    return %c0_i32, %c0_i32_0 : i32, i32
  }
  func.func @transform_2(%arg0: i32) -> (i32, i32) {
    %c0_i32 = arith.constant 0 : i32
    %c0_i32_0 = arith.constant 0 : i32
    %c0_i32_1 = arith.constant 0 : i32
    return %c0_i32, %c0_i32_0 : i32, i32
  }
  func.func @transform_3(%arg0: i32) -> (i32, i32) {
    %c0_i32 = arith.constant 0 : i32
    %c0_i32_0 = arith.constant 0 : i32
    %c0_i32_1 = arith.constant 0 : i32
    return %c0_i32, %c0_i32_0 : i32, i32
  }
  func.func @transform_4(%arg0: i32) -> (i32, i32) {
    %c0_i32 = arith.constant 0 : i32
    %c0_i32_0 = arith.constant 0 : i32
    %c0_i32_1 = arith.constant 0 : i32
    return %c0_i32, %c0_i32_0 : i32, i32
  }
  func.func @transform_5(%arg0: i32) -> (i32, i32) {
    %c0_i32 = arith.constant 0 : i32
    %c0_i32_0 = arith.constant 0 : i32
    %c0_i32_1 = arith.constant 0 : i32
    return %c0_i32, %c0_i32_0 : i32, i32
  }
  func.func @transform_6(%arg0: i32) -> (i32, i32) {
    %c0_i32 = arith.constant 0 : i32
    %c0_i32_0 = arith.constant 0 : i32
    %c0_i32_1 = arith.constant 0 : i32
    return %c0_i32, %c0_i32_0 : i32, i32
  }
  func.func @transform_7(%arg0: i32) -> (i32, i32) {
    %c0_i32 = arith.constant 0 : i32
    %c0_i32_0 = arith.constant 0 : i32
    %c0_i32_1 = arith.constant 0 : i32
    return %c0_i32, %c0_i32_0 : i32, i32
  }
  func.func @transform_8(%arg0: i32) -> (i32, i32) {
    %c0_i32 = arith.constant 0 : i32
    %c0_i32_0 = arith.constant 0 : i32
    %c0_i32_1 = arith.constant 0 : i32
    return %c0_i32, %c0_i32_0 : i32, i32
  }
  func.func @transform_9(%arg0: i32) -> (i32, i32) {
    %c0_i32 = arith.constant 0 : i32
    %c0_i32_0 = arith.constant 0 : i32
    %c0_i32_1 = arith.constant 0 : i32
    return %c0_i32, %c0_i32_0 : i32, i32
  }
  func.func @transform_10(%arg0: i32) -> (i32, i32) {
    %c0_i32 = arith.constant 0 : i32
    %c0_i32_0 = arith.constant 0 : i32
    %c0_i32_1 = arith.constant 0 : i32
    return %c0_i32, %c0_i32_0 : i32, i32
  }
  func.func @transform_11(%arg0: i32) -> (i32, i32) {
    %c0_i32 = arith.constant 0 : i32
    %c0_i32_0 = arith.constant 0 : i32
    %c0_i32_1 = arith.constant 0 : i32
    return %c0_i32, %c0_i32_0 : i32, i32
  }
  func.func @transform_12(%arg0: i32) -> (i32, i32) {
    %c0_i32 = arith.constant 0 : i32
    %c0_i32_0 = arith.constant 0 : i32
    %c0_i32_1 = arith.constant 0 : i32
    return %c0_i32, %c0_i32_0 : i32, i32
  }
  func.func @transform_13(%arg0: i32) -> (i32, i32) {
    %c0_i32 = arith.constant 0 : i32
    %c0_i32_0 = arith.constant 0 : i32
    %c0_i32_1 = arith.constant 0 : i32
    return %c0_i32, %c0_i32_0 : i32, i32
  }
  func.func @transform_14(%arg0: i32) -> (i32, i32) {
    %c0_i32 = arith.constant 0 : i32
    %c0_i32_0 = arith.constant 0 : i32
    return %arg0, %c0_i32 : i32, i32
  }
}

</mosaic_0001>

<bundles_post_ra>
// kernel: tpu_custom_call.1
= control target key start
LH: loop header
LB: loop body
LE: loop exit
PB: predicated region body
PF: predicated region fallthrough
CT: control target
= control target key end

     0   :  { %19 = vsyncpa [#allocation3], 0  ;;  %s1321_s0 = inlined_call_operand.hbm [shape: f32[8,24], index: 0, kind: input, shape index: {}]   ;;  %s1322_s1 = inlined_call_operand.hbm [shape: f32[1,8], index: 1, kind: input, shape index: {}]   ;;  %s1323_s2 = inlined_call_operand.hbm [shape: f32[8,32], index: 2, kind: input, shape index: {}]   ;;  %s1324_s3 = inlined_call_operand.hbm [shape: f32[8,32], index: 3, kind: input, shape index: {}]   ;;  %s1325_s4 = inlined_call_operand.vmem [shape: f32[1,32], index: 4, kind: input, shape index: {}]   ;;  %s1326_s5 = inlined_call_operand.hbm [shape: f32[24,128], index: 5, kind: input, shape index: {}]   ;;  %s1327_s6 = inlined_call_operand.hbm [shape: f32[32,128], index: 6, kind: input, shape index: {}]   ;;  %s1328_s7 = inlined_call_operand.vmem [shape: f32[1,128], index: 7, kind: input, shape index: {}]   ;;  %s1329_s8 = inlined_call_operand.hbm [shape: f32[128,128], index: 8, kind: input, shape index: {}]   ;;  %s1330_s9 = inlined_call_operand.vmem [shape: f32[1,128], index: 9, kind: input, shape index: {}]   ;;  %s1331_s10 = inlined_call_operand.hbm [shape: f32[128,128], index: 10, kind: input, shape index: {}]   ;;  %s1332_s11 = inlined_call_operand.vmem [shape: f32[1,128], index: 11, kind: input, shape index: {}]   ;;  %s1333_s12 = inlined_call_operand.hbm [shape: f32[128,128], index: 12, kind: input, shape index: {}]   ;;  %s1334_s13 = inlined_call_operand.vmem [shape: f32[1,128], index: 13, kind: input, shape index: {}]   ;;  %s1335_s14 = inlined_call_operand.hbm [shape: f32[8,128], index: 14, kind: output, shape index: {}]  }
   0x1   :  { %20 = vsyncpa [#allocation6], 0 }
   0x2   :  { %21 = vsyncpa [#allocation9], 0 }
   0x3   :  { %22 = vsyncpa [#allocation12], 0 }
   0x4   :  { %23 = vsyncpa [#allocation15], 0  ;;  %s41_s15 = sshll.u32 %s1322_s1, 4  ;;  %s42_s15 = int_to_ptr.hbm [resolvable:$true] %s41_s15 }
   0x5   :  { %24 = vsyncpa [#allocation4], 0  ;;  %s1108_s16 = smov [#allocation5]   ;;  %s63_s20 = sshll.u32 %s1324_s3, 4  ;;  %s64_s20 = int_to_ptr.hbm [resolvable:$true] %s63_s20 }
   0x6   :  { %s43_s17 = sshll.u32 %s1108_s16, 4  ;;  %s1109_s21 = smov [#allocation8]   ;;  %s44_s17 = int_to_ptr.vmem [resolvable:$true] %s43_s17 }
   0x7   :  { %46 = dma.hbm_to_vmem [thread:$0]  %s42_s15, 16, %s44_s17, [#allocation6]  }
   0x8   :  { %s65_s22 = sshll.u32 %s1109_s21, 4  ;;  %s88_s25 = sshll.u32 %s1327_s6, 4  ;;  %s66_s22 = int_to_ptr.vmem [resolvable:$true] %s65_s22  ;;  %s89_s25 = int_to_ptr.hbm [resolvable:$true] %s88_s25 }
   0x9   :  { %68 = dma.hbm_to_vmem [thread:$0]  %s64_s20, 128, %s66_s22, [#allocation9]  }
   0xa   :  { %s1110_s1 = smov [#allocation11]   ;;  %s118_s29 = sshll.u32 %s1331_s10, 4  ;;  %s119_s29 = int_to_ptr.hbm [resolvable:$true] %s118_s29 }
   0xb   :  { %s90_s26 = sshll.u32 %s1110_s1, 4  ;;  %s1111_s30 = smov 128   ;;  %s91_s26 = int_to_ptr.vmem [resolvable:$true] %s90_s26 }
   0xc   :  { %s1112_s3 = smov 8   ;;  %s1113_s15 = smov [#allocation14]  }
   0xd   :  { %96 = dma.hbm_to_vmem [thread:$0]  %s89_s25, 512, %s91_s26, [#allocation12], %s1111_s30, %s1111_s30, %s1112_s3  }
   0xe   :  { %s120_s16 = sshll.u32 %s1113_s15, 4  ;;  %s30_s6 = sshll.u32 %s1321_s0, 4  ;;  %s121_s16 = int_to_ptr.vmem [resolvable:$true] %s120_s16  ;;  %s31_s6 = int_to_ptr.hbm [resolvable:$true] %s30_s6 }
   0xf   :  { %126 = dma.hbm_to_vmem [thread:$0]  %s119_s29, 2048, %s121_s16, [#allocation15], %s1111_s30, %s1111_s30, %s1112_s3  }
  0x10   :  { %s52_s20 = sshll.u32 %s1323_s2, 4  ;;  %s1114_s21 = smov [#allocation2]   ;;  %s53_s20 = int_to_ptr.hbm [resolvable:$true] %s52_s20 }
  0x11   :  { %s32_s22 = sshll.u32 %s1114_s21, 4  ;;  %s1115_s23 = smov [#allocation7]   ;;  %s33_s22 = int_to_ptr.vmem [resolvable:$true] %s32_s22 }
  0x12   :  { %35 = dma.hbm_to_vmem [thread:$0]  %s31_s6, 128, %s33_s22, [#allocation3]  }
  0x13   :  { %s54_s24 = sshll.u32 %s1115_s23, 4  ;;  %s75_s0 = sshll.u32 %s1326_s5, 4  ;;  %s55_s24 = int_to_ptr.vmem [resolvable:$true] %s54_s24  ;;  %s76_s0 = int_to_ptr.hbm [resolvable:$true] %s75_s0 }
  0x14   :  { %57 = dma.hbm_to_vmem [thread:$0]  %s53_s20, 128, %s55_s24, [#allocation6]  }
  0x15   :  { %s103_s28 = sshll.u32 %s1329_s8, 4  ;;  %s1116_s29 = smov [#allocation10]   ;;  %s104_s28 = int_to_ptr.hbm [resolvable:$true] %s103_s28 }
  0x16   :  { %s77_s2 = sshll.u32 %s1116_s29, 4  ;;  %s1117_s15 = smov [#allocation13]   ;;  %s78_s2 = int_to_ptr.vmem [resolvable:$true] %s77_s2 }
  0x17   :  { %83 = dma.hbm_to_vmem [thread:$0]  %s76_s0, 384, %s78_s2, [#allocation9], %s1111_s30, %s1111_s30, %s1112_s3  }
  0x18   :  { %s105_s16 = sshll.u32 %s1117_s15, 4  ;;  %s133_s5 = sshll.u32 %s1333_s12, 4  ;;  %s106_s16 = int_to_ptr.vmem [resolvable:$true] %s105_s16  ;;  %s134_s5 = int_to_ptr.hbm [resolvable:$true] %s133_s5 }
  0x19   :  { %111 = dma.hbm_to_vmem [thread:$0]  %s104_s28, 2048, %s106_s16, [#allocation12], %s1111_s30, %s1111_s30, %s1112_s3  }
  0x1a   :  { %s1118_s8 = smov [#allocation16]  }
  0x1b   :  { %s135_s6 = sshll.u32 %s1118_s8, 4  ;;  %s136_s6 = int_to_ptr.vmem [resolvable:$true] %s135_s6 }
  0x1c   :  { %141 = dma.hbm_to_vmem [thread:$0]  %s134_s5, 2048, %s136_s6, [#allocation15], %s1111_s30, %s1111_s30, %s1112_s3  }
  0x1d   :  { %1096 = dma.done.wait [#allocation3], 128  }
  0x1e   :  { %1097 = vsyncadd [#allocation3], 4294967168 }
  0x1f   :  { %1098 = dma.done.wait [#allocation6], 144  }
  0x20   :  { %1099 = vsyncadd [#allocation6], 4294967152 }
  0x21   :  { %1100 = dma.done.wait [#allocation9], 512  }
  0x22   :  { %1101 = vsyncadd [#allocation9], 4294966784 }
  0x23   :  { %1102 = dma.done.wait [#allocation12], 2560  }
  0x24   :  { %1103 = vsyncadd [#allocation12], 4294964736 }
  0x25   :  { %1104 = dma.done.wait [#allocation15], 4096  }
  0x26   :  { %1105 = vsyncadd [#allocation15], 4294963200  ;;  %v1119_v0 = vmov 23   ;;  %v1245_v1 = vld [vmem:[#allocation2] sm:$0xff]  ;;  %v501_v2 = vld [vmem:[#allocation8] sm:$0xff]  ;;  %s1127_s21 = smov [#allocation17]  }
  0x27   :  { %833 = vset.pattern.permute.xlu0 %v1119_v0  ;;  %521 = vmatpush.msra.mxu2 %v501_v2  ;;  %v834_v3 = vld [vmem:[#allocation5] ss:$0 sm:$0xff]  ;;  %v1120_v17 = vmov 683565275   ;;  %v1121_v19 = vmov 2475754826  }
  0x28   :  { %184 = vperm.xlu0 %833, %v1245_v1   ;;  %v1122_v21 = vmov 2131351028   ;;  %v1123_v23 = vmov 2102212464   ;;  %v1124_v28 = vmov 920167782  }
  0x29   :  { %v1125_v31 = vmov 1326507024   ;;  %s787_s22 = sshll.u32 %s1127_s21, 4  ;;  %s789_s25 = sshll.u32 %s1335_s14, 4  ;;  %s788_s22 = int_to_ptr.vmem [resolvable:$true] %s787_s22  ;;  %s790_s25 = int_to_ptr.hbm [resolvable:$true] %s789_s25 }
  0x9a   :  { %v185_v4 = vpop.permute.xlu0 %184 }
  0x9b   :  { %v1248_v5 = vmul.f32 %v834_v3, %v185_v4  ;;  %v1126_v4 = vmov 0  }
  0x9d   :  { %v194_v6 = vand.u32 2139095040, %v1248_v5  ;;  %v191_v8 = vand.u32 2147483647, %v1248_v5  ;;  %vm193_vm12 = vcmp.lt.s32.totalorder %v1248_v5, 0 }
  0x9f   :  { %v195_v7 = vshrl.u32 %v194_v6, 23  ;;  %v198_v11 = vand.u32 8388607, %v191_v8  ;;  %vm192_vm13 = vcmp.le.f32.partialorder %v191_v8, 0.7853982 }
  0xa1   :  { %v803_v9 = vadd.s32 4294967169, %v195_v7  ;;  %v199_v14 = vor.u32 8388608, %v198_v11 }
  0xa3   :  { %v201_v10 = vadd.s32 1, %v803_v9  ;;  %v1263_v33 = vshll.u32 %v199_v14, 8 }
  0xa5   :  { %vm202_vm0 = vcmp.gt.s32.totalorder %v201_v10, 0  ;;  %v240_v45 = vand.u32 65535, %v1263_v33  ;;  %v241_v47 = vshrl.u32 %v1263_v33, 16 }
  0xa6   :  { %v203_v12 = vsel %vm202_vm0, %v201_v10, 0 }
  0xa7   :  { %v205_v13 = vand.u32 31, %v203_v12  ;;  %v1254_v15 = vshrl.u32 %v203_v12, 5 }
  0xa9   :  { %v1256_v16 = vsub.s32 32, %v205_v13  ;;  %v208_v18 = vshll.u32 %v1120_v17, %v205_v13  ;;  %v211_v20 = vshll.u32 %v1121_v19, %v205_v13  ;;  %v214_v22 = vshll.u32 %v1122_v21, %v205_v13 }
  0xaa   :  { %v217_v24 = vshll.u32 %v1123_v23, %v205_v13  ;;  %v220_v30 = vshll.u32 %v1124_v28, %v205_v13  ;;  %vm223_vm1 = vcmp.lt.s32.totalorder %v1254_v15, 1  ;;  %vm226_vm2 = vcmp.lt.s32.totalorder %v1254_v15, 4 }
  0xab   :  { %v209_v25 = vshrl.u32 %v1121_v19, %v1256_v16  ;;  %v212_v26 = vshrl.u32 %v1122_v21, %v1256_v16  ;;  %v215_v27 = vshrl.u32 %v1123_v23, %v1256_v16  ;;  %v218_v29 = vshrl.u32 %v1124_v28, %v1256_v16 }
  0xac   :  { %v221_v32 = vshrl.u32 %v1125_v31, %v1256_v16  ;;  %vm225_vm3 = vcmp.lt.s32.totalorder %v1254_v15, 3  ;;  %vm224_vm4 = vcmp.lt.s32.totalorder %v1254_v15, 2  ;;  %v207_v11 = vshrl.u32 %v1120_v17, %v1256_v16 }
  0xad   :  { %v210_v34 = vor.u32 %v209_v25, %v208_v18  ;;  %v213_v35 = vor.u32 %v212_v26, %v211_v20  ;;  %v216_v36 = vor.u32 %v215_v27, %v214_v22  ;;  %v219_v37 = vor.u32 %v218_v29, %v217_v24 }
  0xae   :  { %v222_v38 = vor.u32 %v221_v32, %v220_v30 }
  0xaf   :  { %v231_v39 = vsel %vm223_vm1, %v210_v34, %v213_v35  ;;  %v232_v40 = vsel %vm226_vm2, %v219_v37, 920167782  ;;  %v235_v41 = vsel %vm223_vm1, %v213_v35, %v216_v36  ;;  %v228_v7 = vsel %vm226_vm2, %v216_v36, 2102212464 }
  0xb0   :  { %v233_v42 = vsel %vm225_vm3, %v216_v36, %v232_v40  ;;  %v236_v43 = vsel %vm226_vm2, %v222_v38, 1326507024  ;;  %v227_v20 = vsel %vm223_vm1, %v207_v11, %v210_v34  ;;  %v229_v21 = vsel %vm225_vm3, %v213_v35, %v228_v7 }
  0xb1   :  { %v237_v44 = vsel %vm225_vm3, %v219_v37, %v236_v43  ;;  %v234_v46 = vsel %vm224_vm4, %v231_v39, %v233_v42  ;;  %v230_v16 = vsel %vm224_vm4, %v227_v20, %v229_v21  ;;  %vm502_vm1 = vcmask 64512  }
  0xb2   :  { %v238_v48 = vsel %vm224_vm4, %v235_v41, %v237_v44  ;;  %v264_v49 = vand.u32 65535, %v234_v46  ;;  %v265_v50 = vshrl.u32 %v234_v46, 16  ;;  %v284_v31 = vmul.u32 %v1263_v33, %v230_v16 }
  0xb3   :  { %v242_v51 = vand.u32 65535, %v238_v48  ;;  %v243_v52 = vshrl.u32 %v238_v48, 16  ;;  %vm334_vm2 = vweird.f32 %v1248_v5 }
  0xb4   :  { %v267_v53 = vmul.u32 %v265_v50, %v240_v45  ;;  %v268_v54 = vmul.u32 %v264_v49, %v241_v47  ;;  %v266_v57 = vmul.u32 %v264_v49, %v240_v45  ;;  %v269_v61 = vmul.u32 %v265_v50, %v241_v47  ;;  %v500_v50 = vld [vmem:[#allocation7] sm:$0xff] }
  0xb5   :  { %v245_v55 = vmul.u32 %v243_v52, %v240_v45  ;;  %v246_v56 = vmul.u32 %v242_v51, %v241_v47  ;;  %v244_v59 = vmul.u32 %v242_v51, %v240_v45  ;;  %v247_v62 = vmul.u32 %v243_v52, %v241_v47  ;;  %544 = vmatpush.msrb.mxu2 %v500_v50  ;;  %v651_v50 = vld [vmem:[#allocation13 + $0x70] sm:$0xff] }
  0xb6   :  { %v270_v58 = vshll.u32 %v267_v53, 16  ;;  %v272_v63 = vshll.u32 %v268_v54, 16  ;;  %v271_v18 = vshrl.u32 %v267_v53, 16  ;;  %v273_v24 = vshrl.u32 %v268_v54, 16 }
  0xb7   :  { %v248_v60 = vshll.u32 %v245_v55, 16  ;;  %v250_v2 = vshll.u32 %v246_v56, 16  ;;  %v249_v22 = vshrl.u32 %v245_v55, 16  ;;  %v251_v26 = vshrl.u32 %v246_v56, 16 }
  0xb8   :  { %vm274_vm5 = vc.u32 %v266_v57, %v270_v58  ;;  %v276_v0 = vadd.s32 %v270_v58, %v266_v57 }
  0xb9   :  { %vm252_vm6 = vc.u32 %v244_v59, %v248_v60  ;;  %v254_v3 = vadd.s32 %v248_v60, %v244_v59  ;;  %v275_v6 = vsel %vm274_vm5, 1, %v1126_v4 }
  0xba   :  { %v253_v9 = vsel %vm252_vm6, 1, %v1126_v4  ;;  %v277_v10 = vadd.s32 %v275_v6, %v269_v61  ;;  %vm278_vm7 = vc.u32 %v276_v0, %v272_v63  ;;  %v280_v29 = vadd.s32 %v276_v0, %v272_v63 }
  0xbb   :  { %v255_v12 = vadd.s32 %v253_v9, %v247_v62  ;;  %vm256_vm8 = vc.u32 %v254_v3, %v250_v2  ;;  %v279_v13 = vsel %vm278_vm7, 1, %v1126_v4  ;;  %vm573_vm6 = vcmask 261120  }
  0xbc   :  { %v257_v14 = vsel %vm256_vm8, 1, %v1126_v4  ;;  %v281_v19 = vadd.s32 %v279_v13, %v277_v10  ;;  %vm597_vm7 = vcmask 195584  }
  0xbd   :  { %v259_v23 = vadd.s32 %v257_v14, %v255_v12 }
  0xbe   :  { %v282_v25 = vadd.s32 %v281_v19, %v271_v18 }
  0xbf   :  { %v260_v27 = vadd.s32 %v259_v23, %v249_v22 }
  0xc0   :  { %v283_v17 = vadd.s32 %v282_v25, %v273_v24 }
  0xc1   :  { %v261_v28 = vadd.s32 %v260_v27, %v251_v26 }
  0xc2   :  { %v287_v30 = vadd.s32 1, %v283_v17 }
  0xc3   :  { %vm286_vm9 = vc.u32 %v261_v28, %v280_v29  ;;  %v285_v43 = vadd.s32 %v280_v29, %v261_v28  ;;  %v835_v28 = vld [vmem:[%s1325_s4] ss:$0 sm:$0xff] }
  0xc4   :  { %v288_v32 = vsel %vm286_vm9, %v287_v30, %v283_v17 }
  0xc5   :  { %v289_v34 = vadd.s32 %v288_v32, %v284_v31  ;;  %v572_v31 = vld [vmem:[#allocation11 + $0x18] sm:$0xff]  ;;  %v571_v32 = vld [vmem:[#allocation11 + $0x10] sm:$0xff] }
  0xc7   :  { %v290_v36 = vadd.s32 536870912, %v289_v34 }
  0xc9   :  { %v291_v35 = vshrl.u32 %v290_v36, 30  ;;  %v570_v36 = vld [vmem:[#allocation11 + $0x8] sm:$0xff] }
  0xcb   :  { %v292_v37 = vshll.u32 %v291_v35, 30  ;;  %v315_v61 = vsub.s32 4, %v291_v35 }
  0xcd   :  { %v293_v38 = vsub.s32 %v289_v34, %v292_v37  ;;  %v316_v3 = vsel %vm193_vm12, %v315_v61, %v291_v35  ;;  %v569_v35 = vld [vmem:[#allocation11] sm:$0xff]  ;;  %v836_v61 = vld [vmem:[%s1328_s7] ss:$0 sm:$0xff] }
  0xce   :  { %v318_v7 = vsel %vm192_vm13, 0, %v316_v3 }
  0xcf   :  { %vm294_vm10 = vcmp.lt.s32.totalorder %v293_v38, 0  ;;  %v295_v39 = vsub.s32 0, %v293_v38  ;;  %v335_v8 = vadd.s32 3, %v318_v7  ;;  %v490_v13 = vand.u32 3, %v318_v7  ;;  %v637_v7 = vld [vmem:[#allocation13] sm:$0xff] }
  0xd1   :  { %v296_v40 = vsel %vm294_vm10, %v295_v39, %v293_v38  ;;  %vm492_vm14 = vcmp.eq.s32.totalorder %v490_v13, 0  ;;  %vm495_vm15 = vcmp.eq.s32.totalorder %v490_v13, 2  ;;  %v336_v20 = vand.u32 3, %v335_v8  ;;  %v567_v39 = vld [vmem:[#allocation10 + $0x8] sm:$0xff] }
  0xd2   :  { %v297_v41 = vclz %v296_v40  ;;  %vm491_vm0 = vcmp.lt.s32.totalorder %v490_v13, 2  ;;  %v566_v40 = vld [vmem:[#allocation10] sm:$0xff] }
  0xd3   :  { %vm338_vm3 = vcmp.eq.s32.totalorder %v336_v20, 0  ;;  %vm341_vm4 = vcmp.eq.s32.totalorder %v336_v20, 2  ;;  %vm337_vm5 = vcmp.lt.s32.totalorder %v336_v20, 2 }
  0xd4   :  { %v804_v42 = vadd.s32 4294967294, %v297_v41 }
  0xd6   :  { %vm805_vm11 = vcmp.lt.s32.totalorder %v804_v42, 0 }
  0xd7   :  { %v300_v15 = vsel %vm805_vm11, 0, %v804_v42 }
  0xd8   :  { %v301_v44 = vsub.s32 32, %v300_v15  ;;  %v305_v45 = vsub.s32 4294967266, %v300_v15  ;;  %v302_v46 = vshll.u32 %v293_v38, %v300_v15  ;;  %v568_v38 = vld [vmem:[#allocation10 + $0x10] sm:$0xff] }
  0xda   :  { %v303_v47 = vshrl.u32 %v285_v43, %v301_v44  ;;  %v306_v33 = vadd.s32 127, %v305_v45 }
  0xdc   :  { %v304_v48 = vor.u32 %v303_v47, %v302_v46  ;;  %v307_v49 = vshll.u32 %v306_v33, 23 }
  0xde   :  { %v308_v51 = vor.u32 4788187, %v307_v49  ;;  %v311_v53 = vcvt.s32.f32 %v304_v48  ;;  %v652_v49 = vld [vmem:[#allocation13 + $0x78] sm:$0xff] }
  0xdf   :  { %657 = vmatpush.msra.mxu0 %v652_v49  ;;  %v756_v49 = vld [vmem:[#allocation16 + $0x78] sm:$0xff] }
  0xe0   :  { %v309_v52 = vand.u32 2147483647, %v308_v51  ;;  %v650_v51 = vld [vmem:[#allocation13 + $0x68] sm:$0xff]  ;;  %761 = vmatpush.msra.mxu3 %v756_v49 }
  0xe1   :  { %658 = vmatpush.msra.mxu0 %v651_v50  ;;  %v755_v50 = vld [vmem:[#allocation16 + $0x70] sm:$0xff] }
  0xe2   :  { %v312_v54 = vmul.f32 %v311_v53, %v309_v52  ;;  %v649_v52 = vld [vmem:[#allocation13 + $0x60] sm:$0xff]  ;;  %v648_v53 = vld [vmem:[#allocation13 + $0x58] sm:$0xff]  ;;  %762 = vmatpush.msra.mxu3 %v755_v50 }
  0xe3   :  { %659 = vmatpush.msra.mxu0 %v650_v51  ;;  %v754_v51 = vld [vmem:[#allocation16 + $0x68] sm:$0xff] }
  0xe4   :  { %v313_v55 = vxor.u32 2147483648, %v312_v54  ;;  %763 = vmatpush.msra.mxu3 %v754_v51 }
  0xe5   :  { %660 = vmatpush.msra.mxu0 %v649_v52  ;;  %v753_v52 = vld [vmem:[#allocation16 + $0x60] sm:$0xff] }
  0xe6   :  { %v314_v56 = vsel %vm193_vm12, %v313_v55, %v312_v54  ;;  %v647_v54 = vld [vmem:[#allocation13 + $0x50] sm:$0xff]  ;;  %v646_v55 = vld [vmem:[#allocation13 + $0x48] sm:$0xff]  ;;  %764 = vmatpush.msra.mxu3 %v753_v52 }
  0xe7   :  { %v317_v57 = vsel %vm192_vm13, %v1248_v5, %v314_v56  ;;  %661 = vmatpush.msra.mxu0 %v648_v53  ;;  %v645_v56 = vld [vmem:[#allocation13 + $0x40] sm:$0xff]  ;;  %v752_v53 = vld [vmem:[#allocation16 + $0x58] sm:$0xff] }
  0xe8   :  { %v319_v58 = vmul.f32 %v317_v57, %v317_v57  ;;  %765 = vmatpush.msra.mxu3 %v752_v53 }
  0xe9   :  { %662 = vmatpush.msra.mxu0 %v647_v54  ;;  %v751_v54 = vld [vmem:[#allocation16 + $0x50] sm:$0xff] }
  0xea   :  { %v320_v59 = vmul.f32 -0.001358992, %v319_v58  ;;  %v327_v60 = vmul.f32 -0.00019511016, %v319_v58  ;;  %766 = vmatpush.msra.mxu3 %v751_v54 }
  0xeb   :  { %663 = vmatpush.msra.mxu0 %v646_v55  ;;  %v750_v55 = vld [vmem:[#allocation16 + $0x48] sm:$0xff] }
  0xec   :  { %v321_v62 = vadd.f32 0.041655596, %v320_v59  ;;  %v328_v63 = vadd.f32 0.008332121, %v327_v60  ;;  %v643_v59 = vld [vmem:[#allocation13 + $0x30] sm:$0xff]  ;;  %v641_v60 = vld [vmem:[#allocation13 + $0x20] sm:$0xff]  ;;  %767 = vmatpush.msra.mxu3 %v750_v55 }
  0xed   :  { %664 = vmatpush.msra.mxu0 %v645_v56  ;;  %v749_v56 = vld [vmem:[#allocation16 + $0x40] sm:$0xff] }
  0xee   :  { %v322_v0 = vmul.f32 %v321_v62, %v319_v58  ;;  %v329_v2 = vmul.f32 %v328_v63, %v319_v58  ;;  %v640_v62 = vld [vmem:[#allocation13 + $0x18] sm:$0xff]  ;;  %768 = vmatpush.msra.mxu3 %v749_v56 }
  0xf0   :  { %v323_v4 = vadd.f32 -0.4999988, %v322_v0  ;;  %v330_v6 = vadd.f32 -0.16666654, %v329_v2  ;;  %v639_v2 = vld [vmem:[#allocation13 + $0x10] sm:$0xff] }
  0xf2   :  { %v324_v9 = vmul.f32 %v323_v4, %v319_v58  ;;  %v331_v10 = vmul.f32 %v330_v6, %v319_v58  ;;  %v638_v4 = vld [vmem:[#allocation13 + $0x8] sm:$0xff] }
  0xf4   :  { %v325_v11 = vadd.f32 1.0, %v324_v9  ;;  %v332_v12 = vadd.f32 1.0, %v331_v10 }
  0xf6   :  { %v333_v14 = vmul.f32 %v332_v12, %v317_v57  ;;  %v342_v18 = vxor.u32 2147483648, %v325_v11  ;;  %v644_v57 = vld [vmem:[#allocation13 + $0x38] sm:$0xff] }
  0xf7   :  { %665 = vmatpush.msra.mxu0 %v644_v57  ;;  %v748_v57 = vld [vmem:[#allocation16 + $0x38] sm:$0xff] }
  0xf8   :  { %v339_v19 = vxor.u32 2147483648, %v333_v14  ;;  %v497_v22 = vsel %vm495_vm15, %v342_v18, %v333_v14  ;;  %v343_v26 = vsel %vm341_vm4, %v342_v18, %v333_v14  ;;  %769 = vmatpush.msra.mxu3 %v748_v57 }
  0xf9   :  { %666 = vmatpush.msra.mxu0 %v643_v59  ;;  %v746_v59 = vld [vmem:[#allocation16 + $0x28] sm:$0xff] }
  0xfa   :  { %v494_v21 = vsel %vm492_vm14, %v325_v11, %v339_v19  ;;  %v340_v25 = vsel %vm338_vm3, %v325_v11, %v339_v19 }
  0xfb   :  { %v498_v23 = vsel %vm491_vm0, %v494_v21, %v497_v22  ;;  %v344_v27 = vsel %vm337_vm5, %v340_v25, %v343_v26  ;;  %v704_v22 = vld [vmem:[#allocation14 + $0x78] sm:$0xff]  ;;  %v701_v25 = vld [vmem:[#allocation14 + $0x60] sm:$0xff] }
  0xfc   :  { %v499_v24 = vsel %vm334_vm2, nan, %v498_v23  ;;  %v345_v16 = vsel %vm334_vm2, nan, %v344_v27  ;;  %v703_v23 = vld [vmem:[#allocation14 + $0x70] sm:$0xff]  ;;  %709 = vmatpush.msra.mxu1 %v704_v22  ;;  %v700_v26 = vld [vmem:[#allocation14 + $0x58] sm:$0xff] }
  0xfd   :  { %809 = vmatmul.msk.f32.vlgmr.msra.gmra.mxu2 %vm502_vm1, %v499_v24  ;;  %v702_v24 = vld [vmem:[#allocation14 + $0x68] sm:$0xff]  ;;  %v699_v27 = vld [vmem:[#allocation14 + $0x50] sm:$0xff] }
  0xfe   :  { %589 = vmatpush.msra.mxu2 %v572_v31  ;;  %710 = vmatpush.msra.mxu1 %v703_v23  ;;  %v693_v31 = vld [vmem:[#allocation14 + $0x20] sm:$0xff] }
 0x100   :  { %590 = vmatpush.msra.mxu2 %v571_v32  ;;  %711 = vmatpush.msra.mxu1 %v702_v24  ;;  %v692_v32 = vld [vmem:[#allocation14 + $0x18] sm:$0xff] }
 0x102   :  { %591 = vmatpush.msra.mxu2 %v570_v36  ;;  %712 = vmatpush.msra.mxu1 %v701_v25 }
 0x104   :  { %592 = vmatpush.msra.mxu2 %v569_v35  ;;  %713 = vmatpush.msra.mxu1 %v700_v26 }
 0x105   :  { %810 = vmatmul.msk.f32.vlgmr.msrb.gmra.mxu2 %vm502_vm1, %v345_v16  ;;  %v698_v16 = vld [vmem:[#allocation14 + $0x48] sm:$0xff] }
 0x106   :  { %613 = vmatpush.msrb.mxu2 %v568_v38  ;;  %714 = vmatpush.msra.mxu1 %v699_v27 }
 0x108   :  { %614 = vmatpush.msrb.mxu2 %v567_v39  ;;  %715 = vmatpush.msra.mxu1 %v698_v16  ;;  %v689_v39 = vld [vmem:[#allocation14] sm:$0xff] }
 0x10a   :  { %615 = vmatpush.msrb.mxu2 %v566_v40 }
 0x180   :  { %v523_v17 = vpop.f32.mrf.mxu2 }
 0x188   :  { %v546_v29 = vpop.f32.mrf.mxu2 }
 0x189   :  { %v547_v30 = vadd.f32 %v546_v29, %v523_v17  ;;  %v697_v17 = vld [vmem:[#allocation14 + $0x40] sm:$0xff]  ;;  %v695_v29 = vld [vmem:[#allocation14 + $0x30] sm:$0xff] }
 0x18a   :  { %716 = vmatpush.msra.mxu1 %v697_v17 }
 0x18b   :  { %v553_v5 = vadd.f32 %v835_v28, %v547_v30  ;;  %v696_v28 = vld [vmem:[#allocation14 + $0x38] sm:$0xff]  ;;  %v694_v30 = vld [vmem:[#allocation14 + $0x28] sm:$0xff] }
 0x18c   :  { %717 = vmatpush.msra.mxu1 %v696_v28 }
 0x18d   :  { %v554_v34 = vmin.f32 %v553_v5, 30.0 }
 0x18e   :  { %718 = vmatpush.msra.mxu1 %v695_v29 }
 0x18f   :  { %v555_v37 = vmul.f32 1.442695, %v554_v34  ;;  %v691_v34 = vld [vmem:[#allocation14 + $0x10] sm:$0xff] }
 0x190   :  { %719 = vmatpush.msra.mxu1 %v694_v30 }
 0x191   :  { %840 = vpow2.f32 %v555_v37  ;;  %v690_v37 = vld [vmem:[#allocation14 + $0x8] sm:$0xff] }
 0x192   :  { %720 = vmatpush.msra.mxu1 %v693_v31 }
 0x194   :  { %721 = vmatpush.msra.mxu1 %v692_v32 }
 0x196   :  { %722 = vmatpush.msra.mxu1 %v691_v34 }
 0x197   :  { %v841_v41 = vpop.eup %840 }
 0x198   :  { %v557_v42 = vadd.f32 2.0, %v841_v41  ;;  %723 = vmatpush.msra.mxu1 %v690_v37 }
 0x19a   :  { %v558_v15 = vmul.f32 %v841_v41, %v557_v42  ;;  %724 = vmatpush.msra.mxu1 %v689_v39 }
 0x19c   :  { %v559_v43 = vadd.f32 2.0, %v558_v15 }
 0x19e   :  { %842 = vrcp.f32 %v559_v43 }
 0x1a4   :  { %v843_v44 = vpop.eup %842 }
 0x1a5   :  { %v561_v45 = vmul.f32 %v843_v44, %v559_v43 }
 0x1a7   :  { %v562_v46 = vsub.f32 2.0, %v561_v45 }
 0x1a9   :  { %v563_v47 = vmul.f32 %v843_v44, %v562_v46 }
 0x1ab   :  { %v564_v33 = vmul.f32 %v563_v47, %v558_v15 }
 0x1ad   :  { %v565_v48 = vmul.f32 %v564_v33, %v553_v5  ;;  %v837_v5 = vld [vmem:[%s1330_s9] ss:$0 sm:$0xff] }
 0x1af   :  { %811 = vmatmul.msk.f32.vlgmr.msra.gmra.mxu2 %vm573_vm6, %v565_v48 }
 0x1b7   :  { %812 = vmatmul.msk.f32.vlgmr.msrb.gmra.mxu2 %vm597_vm7, %v1245_v1  ;;  %v642_v1 = vld [vmem:[#allocation13 + $0x28] sm:$0xff] }
 0x1b8   :  { %667 = vmatpush.msra.mxu0 %v642_v1  ;;  %v745_v1 = vld [vmem:[#allocation16 + $0x20] sm:$0xff] }
 0x1ba   :  { %668 = vmatpush.msra.mxu0 %v641_v60  ;;  %v838_v60 = vld [vmem:[%s1332_s11] ss:$0 sm:$0xff] }
 0x1bc   :  { %669 = vmatpush.msra.mxu0 %v640_v62  ;;  %v743_v62 = vld [vmem:[#allocation16 + $0x10] sm:$0xff] }
 0x1be   :  { %670 = vmatpush.msra.mxu0 %v639_v2  ;;  %v742_v2 = vld [vmem:[#allocation16 + $0x8] sm:$0xff] }
 0x1c0   :  { %671 = vmatpush.msra.mxu0 %v638_v4  ;;  %v741_v4 = vld [vmem:[#allocation16] sm:$0xff] }
 0x1c2   :  { %672 = vmatpush.msra.mxu0 %v637_v7 }
 0x232   :  { %v594_v58 = vpop.f32.mrf.mxu2 }
 0x23a   :  { %v617_v63 = vpop.f32.mrf.mxu2 }
 0x23b   :  { %v618_v0 = vadd.f32 %v617_v63, %v594_v58  ;;  %v747_v58 = vld [vmem:[#allocation16 + $0x30] sm:$0xff] }
 0x23c   :  { %770 = vmatpush.msra.mxu3 %v747_v58 }
 0x23d   :  { %v624_v3 = vadd.f32 %v836_v61, %v618_v0  ;;  %v744_v61 = vld [vmem:[#allocation16 + $0x18] sm:$0xff] }
 0x23e   :  { %771 = vmatpush.msra.mxu3 %v746_v59 }
 0x23f   :  { %v625_v6 = vmin.f32 %v624_v3, 30.0 }
 0x240   :  { %772 = vmatpush.msra.mxu3 %v745_v1 }
 0x241   :  { %v626_v9 = vmul.f32 1.442695, %v625_v6 }
 0x242   :  { %773 = vmatpush.msra.mxu3 %v744_v61 }
 0x243   :  { %844 = vpow2.f32 %v626_v9 }
 0x244   :  { %774 = vmatpush.msra.mxu3 %v743_v62 }
 0x246   :  { %775 = vmatpush.msra.mxu3 %v742_v2 }
 0x248   :  { %776 = vmatpush.msra.mxu3 %v741_v4 }
 0x249   :  { %v845_v10 = vpop.eup %844 }
 0x24a   :  { %v628_v11 = vadd.f32 2.0, %v845_v10 }
 0x24c   :  { %v629_v12 = vmul.f32 %v845_v10, %v628_v11 }
 0x24e   :  { %v630_v8 = vadd.f32 2.0, %v629_v12 }
 0x250   :  { %846 = vrcp.f32 %v630_v8 }
 0x256   :  { %v847_v13 = vpop.eup %846 }
 0x257   :  { %v632_v14 = vmul.f32 %v847_v13, %v630_v8 }
 0x259   :  { %v633_v18 = vsub.f32 2.0, %v632_v14 }
 0x25b   :  { %v634_v19 = vmul.f32 %v847_v13, %v633_v18 }
 0x25d   :  { %v635_v20 = vmul.f32 %v634_v19, %v629_v12 }
 0x25f   :  { %v636_v21 = vmul.f32 %v635_v20, %v624_v3  ;;  %v839_v20 = vld [vmem:[%s1334_s13] ss:$0 sm:$0xff] }
 0x261   :  { %673 = vmatmul.f32.vlgmr.msra.gmra.mxu0 %v636_v21 }
 0x2de   :  { %v674_v36 = vpop.f32.mrf.mxu0 }
 0x2df   :  { %v675_v35 = vadd.f32 %v837_v5, %v674_v36 }
 0x2e1   :  { %v677_v38 = vmin.f32 %v675_v35, 30.0 }
 0x2e3   :  { %v678_v40 = vmul.f32 1.442695, %v677_v38 }
 0x2e5   :  { %848 = vpow2.f32 %v678_v40 }
 0x2eb   :  { %v849_v41 = vpop.eup %848 }
 0x2ec   :  { %v680_v42 = vadd.f32 2.0, %v849_v41 }
 0x2ee   :  { %v681_v15 = vmul.f32 %v849_v41, %v680_v42 }
 0x2f0   :  { %v682_v43 = vadd.f32 2.0, %v681_v15 }
 0x2f2   :  { %850 = vrcp.f32 %v682_v43 }
 0x2f8   :  { %v851_v44 = vpop.eup %850 }
 0x2f9   :  { %v684_v45 = vmul.f32 %v851_v44, %v682_v43 }
 0x2fb   :  { %v685_v46 = vsub.f32 2.0, %v684_v45 }
 0x2fd   :  { %v686_v47 = vmul.f32 %v851_v44, %v685_v46 }
 0x2ff   :  { %v687_v33 = vmul.f32 %v686_v47, %v681_v15 }
 0x301   :  { %v688_v48 = vmul.f32 %v687_v33, %v675_v35 }
 0x303   :  { %725 = vmatmul.f32.vlgmr.msra.gmra.mxu1 %v688_v48 }
 0x380   :  { %v726_v63 = vpop.f32.mrf.mxu1 }
 0x381   :  { %v727_v0 = vadd.f32 %v838_v60, %v726_v63 }
 0x383   :  { %v729_v3 = vmin.f32 %v727_v0, 30.0 }
 0x385   :  { %v730_v6 = vmul.f32 1.442695, %v729_v3 }
 0x387   :  { %852 = vpow2.f32 %v730_v6 }
 0x38d   :  { %v853_v7 = vpop.eup %852 }
 0x38e   :  { %v732_v9 = vadd.f32 2.0, %v853_v7 }
 0x390   :  { %v733_v10 = vmul.f32 %v853_v7, %v732_v9 }
 0x392   :  { %v734_v11 = vadd.f32 2.0, %v733_v10 }
 0x394   :  { %854 = vrcp.f32 %v734_v11 }
 0x39a   :  { %v855_v12 = vpop.eup %854 }
 0x39b   :  { %v736_v8 = vmul.f32 %v855_v12, %v734_v11 }
 0x39d   :  { %v737_v13 = vsub.f32 2.0, %v736_v8 }
 0x39f   :  { %v738_v14 = vmul.f32 %v855_v12, %v737_v13 }
 0x3a1   :  { %v739_v18 = vmul.f32 %v738_v14, %v733_v10 }
 0x3a3   :  { %v740_v19 = vmul.f32 %v739_v18, %v727_v0 }
 0x3a5   :  { %777 = vmatmul.f32.vlgmr.msra.gmra.mxu3 %v740_v19 }
 0x428   :  { %v778_v21 = vpop.f32.mrf.mxu3 }
 0x429   :  { %v779_v22 = vadd.f32 %v839_v20, %v778_v21 }
 0x42b   :  { %781 = vst [vmem:[#allocation17] sm:$0xff] %v779_v22 }
 0x42c   :  { %792 = dma.vmem_to_hbm [thread:$0]  %s788_s22, 128, %s790_s25, [#allocation4]  }
 0x42d   :  { %1106 = dma.done.wait [#allocation4], 128  }
 0x42e   :  { %1107 = vsyncadd [#allocation4], 4294967168 }
 0x42f   :  { %797 = vsyncpa [#allocation3], 1 }
 0x430   :  { %798 = vsyncpa [#allocation6], 1 }
 0x431   :  { %799 = vsyncpa [#allocation9], 1 }
 0x432   :  { %800 = vsyncpa [#allocation12], 1 }
 0x433   :  { %801 = vsyncpa [#allocation15], 1 }
 0x434   :  { %802 = vsyncpa [#allocation4], 1 }

</bundles_post_ra>
